<compile_context>
chip_gen: v5e
topology: v5e:2x2
jax: 0.10.0
libtpu: 0.0.40
codegen_flags: <defaults>
</compile_context>

<pallas_src>
import jax
import jax.numpy as jnp
from jax.experimental import pallas as pl
from jax.experimental.pallas import tpu as pltpu

H1, H2 = 256, 128
LANE = 128


def _round_up(x, m):
    return (x + m - 1) // m * m


def _default_epilogue_dtype():
    """bf16 epilogue on chips with a bf16 VPU (v6e/v7x); f32 elsewhere (v5e & older)."""
    try:
        kind = jax.devices()[0].device_kind.lower()
    except Exception:
        return jnp.float32
    return jnp.bfloat16 if ("v6" in kind or "v7" in kind) else jnp.float32


def qnn_kernel(x_ref, w1_ref, b1_ref, w2_ref, b2_ref, w3_ref, b3_ref, out_ref):
    # Dot operands are bf16 (MXU peak rate on v5e/v6e/v7x); the elementwise epilogue
    # dtype follows the bias dtype (bf16 on v6e/v7x, f32 on v5e).
    epi = b1_ref.dtype

    # fc1 (+ folded bn1) -> relu          (dropout1 = identity in eval mode)
    h1 = jnp.dot(x_ref[...], w1_ref[...], preferred_element_type=epi) + b1_ref[...]
    h1 = jnp.maximum(h1, 0).astype(jnp.bfloat16)

    # fc2 (+ folded bn2) -> relu          (dropout2 = identity in eval mode)
    h2 = jnp.dot(h1, w2_ref[...], preferred_element_type=epi) + b2_ref[...]
    h2 = jnp.maximum(h2, 0).astype(jnp.bfloat16)

    # fc3 (f32 accumulate; output padded to one 128-lane slab, sliced outside)
    out_ref[...] = (jnp.dot(h2, w3_ref[...], preferred_element_type=jnp.float32)
                    + b3_ref[...]).astype(out_ref.dtype)


def fold_and_pack(params, epilogue_dtype=jnp.float32):
    """Fold BN into the Linears, cast dot operands to bf16, pad fc3 to 128 lanes."""
    s1, t1 = params["bn1_scale"], params["bn1_shift"]
    s2, t2 = params["bn2_scale"], params["bn2_shift"]

    w1f = (params["w1"] * s1).astype(jnp.bfloat16)            # (S, 256)
    b1f = (params["b1"] * s1 + t1).astype(epilogue_dtype)      # (1, 256)
    w2f = (params["w2"] * s2).astype(jnp.bfloat16)             # (256, 128)
    b2f = (params["b2"] * s2 + t2).astype(epilogue_dtype)      # (1, 128)

    action_size = params["w3"].shape[1]
    n_pad = _round_up(max(action_size, LANE), LANE)
    w3p = jnp.zeros((H2, n_pad), jnp.bfloat16).at[:, :action_size].set(
        params["w3"].astype(jnp.bfloat16))
    b3p = jnp.zeros((1, n_pad), jnp.float32).at[:, :action_size].set(
        params["b3"].astype(jnp.float32))

    return {"w1": w1f, "b1": b1f, "w2": w2f, "b2": b2f,
            "w3": w3p, "b3": b3p, "action_size": action_size, "n_pad": n_pad}


def qnn_forward(x, packed):
    """x: (B, state_size) float. packed: output of fold_and_pack."""
    B, S = x.shape
    n_pad = packed["n_pad"]
    action_size = packed["action_size"]

    # Batch tiling: big tiles (cap 512) amortize the ~600-cycle per-grid-step
    # overhead; for B >= 16 keep at least 2 grid steps so "parallel" can shard the
    # batch axis over both v7x TensorCores (no-op on single-TC v5e/v6e).
    b_min = _round_up(B, 8)
    if b_min >= 16:
        tile_b = min(512, _round_up(pl.cdiv(b_min, 2), 8))
    else:
        tile_b = b_min
    b_pad = _round_up(B, tile_b)

    x = x.astype(jnp.bfloat16)                      # bf16 input: halves the x DMA
    if b_pad != B:
        x = jnp.pad(x, ((0, b_pad - B), (0, 0)))
    grid = (b_pad // tile_b,)

    const = lambda i: (0, 0)   # weights / biases: same block every step (VMEM-resident)
    in_specs = [
        pl.BlockSpec((tile_b, S), lambda i: (i, 0)),
        pl.BlockSpec((S, H1), const), pl.BlockSpec((1, H1), const),
        pl.BlockSpec((H1, H2), const), pl.BlockSpec((1, H2), const),
        pl.BlockSpec((H2, n_pad), const), pl.BlockSpec((1, n_pad), const),
    ]
    out_spec = pl.BlockSpec((tile_b, n_pad), lambda i: (i, 0))

    flops = 2 * b_pad * (S * H1 + H1 * H2 + H2 * n_pad)
    bytes_accessed = (
        x.size * 2                                  # bf16 activations in
        + packed["w1"].size * 2 + packed["w2"].size * 2 + packed["w3"].size * 2
        + packed["b1"].size * packed["b1"].dtype.itemsize
        + packed["b2"].size * packed["b2"].dtype.itemsize
        + packed["b3"].size * 4
        + b_pad * n_pad * 4                         # f32 padded output
    )

    out = pl.pallas_call(
        qnn_kernel,
        out_shape=jax.ShapeDtypeStruct((b_pad, n_pad), jnp.float32),
        grid=grid,
        in_specs=in_specs,
        out_specs=out_spec,
        compiler_params=pltpu.CompilerParams(dimension_semantics=("parallel",)),
        cost_estimate=pl.CostEstimate(flops=flops, transcendentals=0,
                                      bytes_accessed=bytes_accessed),
    )(x, packed["w1"], packed["b1"], packed["w2"], packed["b2"],
      packed["w3"], packed["b3"])

    return out[:B, :action_size]


def init_params(key, state_size, action_size):
    """Deterministic init mirroring the PyTorch module (shapes & init schemes)."""
    ks = jax.random.split(key, 8)

    def kaiming_normal(k, fan_in, fan_out):
        return jax.random.normal(k, (fan_in, fan_out), jnp.float32) * jnp.sqrt(2.0 / fan_in)

    def xavier_normal(k, fan_in, fan_out):
        return jax.random.normal(k, (fan_in, fan_out), jnp.float32) * jnp.sqrt(2.0 / (fan_in + fan_out))

    def bias_uniform(k, fan_in, fan_out):
        bound = 1.0 / jnp.sqrt(fan_in)
        return jax.random.uniform(k, (1, fan_out), jnp.float32, -bound, bound)

    eps = 1e-5

    def bn_fold(num_features):
        gamma = jnp.ones((1, num_features), jnp.float32)
        beta = jnp.zeros((1, num_features), jnp.float32)
        running_mean = jnp.zeros((1, num_features), jnp.float32)
        running_var = jnp.ones((1, num_features), jnp.float32)
        scale = gamma / jnp.sqrt(running_var + eps)
        shift = beta - running_mean * scale
        return scale, shift

    bn1_scale, bn1_shift = bn_fold(H1)
    bn2_scale, bn2_shift = bn_fold(H2)

    return {
        "w1": kaiming_normal(ks[0], state_size, H1),
        "b1": bias_uniform(ks[1], state_size, H1),
        "bn1_scale": bn1_scale, "bn1_shift": bn1_shift,
        "w2": kaiming_normal(ks[2], H1, H2),
        "b2": bias_uniform(ks[3], H1, H2),
        "bn2_scale": bn2_scale, "bn2_shift": bn2_shift,
        "w3": xavier_normal(ks[4], H2, action_size),
        "b3": bias_uniform(ks[5], H2, action_size),
    }


if __name__ == "__main__":
    key = jax.random.PRNGKey(0)
    k_param, k_x = jax.random.split(key)

    batch, state_size, action_size = 32, 16, 4
    params = init_params(k_param, state_size, action_size)
    packed = fold_and_pack(params, epilogue_dtype=_default_epilogue_dtype())
    x = jax.random.normal(k_x, (batch, state_size), jnp.float32)

    out = qnn_forward(x, packed)
    jax.block_until_ready(out)
    assert out.shape == (batch, action_size)

    # Plain-JAX f32 reference (same eval-mode semantics).  Kernel uses bf16 dot
    # operands (+ bf16 epilogue on v6e/v7x) => loosened tolerance.
    h1 = jnp.maximum((x @ params["w1"] + params["b1"]) * params["bn1_scale"]
                     + params["bn1_shift"], 0.0)
    h2 = jnp.maximum((h1 @ params["w2"] + params["b2"]) * params["bn2_scale"]
                     + params["bn2_shift"], 0.0)
    ref = h2 @ params["w3"] + params["b3"]
    max_err = float(jnp.max(jnp.abs(out - ref)))
    assert jnp.allclose(out, ref, atol=5e-2, rtol=5e-2), max_err

    print("KERNEL_OK")
</pallas_src>

<mosaic_0001>
module attributes {stable_mosaic.version = 11 : i64} {
  func.func @qnn_kernel(%arg0: i32, %arg1: memref<16x16xbf16, #tpu.memory_space<vmem>>, %arg2: memref<16x256xbf16, #tpu.memory_space<vmem>>, %arg3: memref<1x256xf32, #tpu.memory_space<vmem>>, %arg4: memref<256x128xbf16, #tpu.memory_space<vmem>>, %arg5: memref<1x128xf32, #tpu.memory_space<vmem>>, %arg6: memref<128x128xbf16, #tpu.memory_space<vmem>>, %arg7: memref<1x128xf32, #tpu.memory_space<vmem>>, %arg8: memref<16x128xf32, #tpu.memory_space<vmem>>) attributes {dimension_semantics = [#tpu.dimension_semantics<parallel>], iteration_bounds = array<i64: 2>, scalar_prefetch = 0 : i64, scratch_operands = 0 : i64, tpu.core_type = #tpu.core_type<tc>, window_params = [{transform_indices = @transform_0, window_bounds = array<i64: 16, 16>}, {pipeline_mode = #tpu.pipeline_mode<synchronous>, transform_indices = @transform_1, window_bounds = array<i64: 16, 256>}, {pipeline_mode = #tpu.pipeline_mode<synchronous>, transform_indices = @transform_2, window_bounds = array<i64: 1, 256>}, {pipeline_mode = #tpu.pipeline_mode<synchronous>, transform_indices = @transform_3, window_bounds = array<i64: 256, 128>}, {pipeline_mode = #tpu.pipeline_mode<synchronous>, transform_indices = @transform_4, window_bounds = array<i64: 1, 128>}, {pipeline_mode = #tpu.pipeline_mode<synchronous>, transform_indices = @transform_5, window_bounds = array<i64: 128, 128>}, {pipeline_mode = #tpu.pipeline_mode<synchronous>, transform_indices = @transform_6, window_bounds = array<i64: 1, 128>}, {transform_indices = @transform_7, window_bounds = array<i64: 16, 128>}]} {
    %c0 = arith.constant 0 : index
    %c0_0 = arith.constant 0 : index
    %0 = vector.load %arg1[%c0, %c0_0] : memref<16x16xbf16, #tpu.memory_space<vmem>>, vector<16x16xbf16>
    %c0_1 = arith.constant 0 : index
    %c0_2 = arith.constant 0 : index
    %1 = vector.load %arg2[%c0_1, %c0_2] : memref<16x256xbf16, #tpu.memory_space<vmem>>, vector<16x256xbf16>
    %cst = arith.constant dense<0.000000e+00> : vector<16x256xf32>
    %2 = tpu.matmul %0, %1, %cst {dimension_numbers = #tpu.dot_dimension_numbers<[1], [0], [0], [1], [0, 0, 1, 1], [], []>} : vector<16x16xbf16>, vector<16x256xbf16>, vector<16x256xf32> -> vector<16x256xf32>
    %c0_3 = arith.constant 0 : index
    %c0_4 = arith.constant 0 : index
    %3 = vector.load %arg3[%c0_3, %c0_4] : memref<1x256xf32, #tpu.memory_space<vmem>>, vector<1x256xf32>
    %4 = vector.broadcast %3 : vector<1x256xf32> to vector<16x256xf32>
    %5 = arith.addf %2, %4 : vector<16x256xf32>
    %cst_5 = arith.constant 0.000000e+00 : f32
    %6 = vector.broadcast %cst_5 : f32 to vector<16x256xf32>
    %7 = arith.maximumf %5, %6 : vector<16x256xf32>
    %8 = arith.truncf %7 : vector<16x256xf32> to vector<16x256xbf16>
    %c0_6 = arith.constant 0 : index
    %c0_7 = arith.constant 0 : index
    %9 = vector.load %arg4[%c0_6, %c0_7] : memref<256x128xbf16, #tpu.memory_space<vmem>>, vector<256x128xbf16>
    %cst_8 = arith.constant dense<0.000000e+00> : vector<16x128xf32>
    %10 = tpu.matmul %8, %9, %cst_8 {dimension_numbers = #tpu.dot_dimension_numbers<[1], [0], [0], [1], [0, 0, 1, 1], [], []>} : vector<16x256xbf16>, vector<256x128xbf16>, vector<16x128xf32> -> vector<16x128xf32>
    %c0_9 = arith.constant 0 : index
    %c0_10 = arith.constant 0 : index
    %11 = vector.load %arg5[%c0_9, %c0_10] : memref<1x128xf32, #tpu.memory_space<vmem>>, vector<1x128xf32>
    %12 = vector.broadcast %11 : vector<1x128xf32> to vector<16x128xf32>
    %13 = arith.addf %10, %12 : vector<16x128xf32>
    %cst_11 = arith.constant 0.000000e+00 : f32
    %14 = vector.broadcast %cst_11 : f32 to vector<16x128xf32>
    %15 = arith.maximumf %13, %14 : vector<16x128xf32>
    %16 = arith.truncf %15 : vector<16x128xf32> to vector<16x128xbf16>
    %c0_12 = arith.constant 0 : index
    %c0_13 = arith.constant 0 : index
    %17 = vector.load %arg6[%c0_12, %c0_13] : memref<128x128xbf16, #tpu.memory_space<vmem>>, vector<128x128xbf16>
    %cst_14 = arith.constant dense<0.000000e+00> : vector<16x128xf32>
    %18 = tpu.matmul %16, %17, %cst_14 {dimension_numbers = #tpu.dot_dimension_numbers<[1], [0], [0], [1], [0, 0, 1, 1], [], []>} : vector<16x128xbf16>, vector<128x128xbf16>, vector<16x128xf32> -> vector<16x128xf32>
    %c0_15 = arith.constant 0 : index
    %c0_16 = arith.constant 0 : index
    %19 = vector.load %arg7[%c0_15, %c0_16] : memref<1x128xf32, #tpu.memory_space<vmem>>, vector<1x128xf32>
    %20 = vector.broadcast %19 : vector<1x128xf32> to vector<16x128xf32>
    %21 = arith.addf %18, %20 : vector<16x128xf32>
    %c0_17 = arith.constant 0 : index
    %c0_18 = arith.constant 0 : index
    %22 = vector.load %arg8[%c0_17, %c0_18] : memref<16x128xf32, #tpu.memory_space<vmem>>, vector<16x128xf32>
    tpu.vector_store %arg8[%c0_17, %c0_18], %21 {strides = array<i32>} : memref<16x128xf32, #tpu.memory_space<vmem>>, vector<16x128xf32>,
    return
  }
  func.func @transform_0(%arg0: i32) -> (i32, i32) {
    %c0_i32 = arith.constant 0 : i32
    %c0_i32_0 = arith.constant 0 : i32
    return %arg0, %c0_i32 : i32, i32
  }
  func.func @transform_1(%arg0: i32) -> (i32, i32) {
    %c0_i32 = arith.constant 0 : i32
    %c0_i32_0 = arith.constant 0 : i32
    %c0_i32_1 = arith.constant 0 : i32
    return %c0_i32, %c0_i32_0 : i32, i32
  }
  func.func @transform_2(%arg0: i32) -> (i32, i32) {
    %c0_i32 = arith.constant 0 : i32
    %c0_i32_0 = arith.constant 0 : i32
    %c0_i32_1 = arith.constant 0 : i32
    return %c0_i32, %c0_i32_0 : i32, i32
  }
  func.func @transform_3(%arg0: i32) -> (i32, i32) {
    %c0_i32 = arith.constant 0 : i32
    %c0_i32_0 = arith.constant 0 : i32
    %c0_i32_1 = arith.constant 0 : i32
    return %c0_i32, %c0_i32_0 : i32, i32
  }
  func.func @transform_4(%arg0: i32) -> (i32, i32) {
    %c0_i32 = arith.constant 0 : i32
    %c0_i32_0 = arith.constant 0 : i32
    %c0_i32_1 = arith.constant 0 : i32
    return %c0_i32, %c0_i32_0 : i32, i32
  }
  func.func @transform_5(%arg0: i32) -> (i32, i32) {
    %c0_i32 = arith.constant 0 : i32
    %c0_i32_0 = arith.constant 0 : i32
    %c0_i32_1 = arith.constant 0 : i32
    return %c0_i32, %c0_i32_0 : i32, i32
  }
  func.func @transform_6(%arg0: i32) -> (i32, i32) {
    %c0_i32 = arith.constant 0 : i32
    %c0_i32_0 = arith.constant 0 : i32
    %c0_i32_1 = arith.constant 0 : i32
    return %c0_i32, %c0_i32_0 : i32, i32
  }
  func.func @transform_7(%arg0: i32) -> (i32, i32) {
    %c0_i32 = arith.constant 0 : i32
    %c0_i32_0 = arith.constant 0 : i32
    return %arg0, %c0_i32 : i32, i32
  }
}

</mosaic_0001>

<bundles_post_ra>
// kernel: tpu_custom_call.1
= control target key start
LH: loop header
LB: loop body
LE: loop exit
PB: predicated region body
PF: predicated region fallthrough
CT: control target
= control target key end

     0   :  { %12 = vsyncpa [#allocation3], 0  ;;  %s1253_s0 = inlined_call_operand.vmem [shape: bf16[32,16], index: 0, kind: input, shape index: {}]   ;;  %s1254_s1 = inlined_call_operand.vmem [shape: bf16[16,256], index: 1, kind: input, shape index: {}]   ;;  %s1255_s2 = inlined_call_operand.vmem [shape: f32[1,256], index: 2, kind: input, shape index: {}]   ;;  %s1256_s3 = inlined_call_operand.hbm [shape: bf16[256,128], index: 3, kind: input, shape index: {}]   ;;  %s1257_s4 = inlined_call_operand.vmem [shape: f32[1,128], index: 4, kind: input, shape index: {}]   ;;  %s1258_s5 = inlined_call_operand.hbm [shape: bf16[128,128], index: 5, kind: input, shape index: {}]   ;;  %s1259_s6 = inlined_call_operand.vmem [shape: f32[1,128], index: 6, kind: input, shape index: {}]   ;;  %s1260_s7 = inlined_call_operand.hbm [shape: f32[32,128], index: 7, kind: output, shape index: {}]  }
   0x1   :  { %13 = vsyncpa [#allocation6], 0 }
   0x2   :  { %14 = vsyncpa [#allocation4], 0 }
   0x3   :  { %16 = vsyncpa [#allocation4 + $0x1], 0  ;;  %s1123_s24 = smov 0   ;;  %s1125_s25 = smov 0  }
   0x4   :  { %s1127_s26 = smov 0   ;;  %s1129_s27 = smov 0  }
   0x5 LB: > { %s1144_s28 = sadd.s32 4294967295, %s1075_s27   ;;  %s725_s29 = sadd.s32 4294967294, %s1075_s27   ;;  %s1075_s27 = sphi %s1129_s27, %s1267_s27   ;;  %s1071_s26 = sphi %s1127_s26, %s1266_s26   ;;  %s1067_s25 = sphi %s1125_s25, %s1265_s25   ;;  %s1063_s24 = sphi %s1123_s24, %s1264_s24  }
   0x6   : > { %s1148_s30 = sadd.s32 1, %s1075_s27   ;;  %s181_s8 = sadd.s32 1, %s1071_s26 }
   0x7   : > { %s178_s9 = ssub.s32 %s1075_s27, %s1148_s30  ;;  %p191_p0 = scmp.ne.s32.totalorder %s1071_s26, %s1067_s25 }
   0x8   : > { %p179_p1 = scmp.eq.s32.totalorder %s178_s9, 0  ;;  %p192_p2 = scmp.eq.s32.totalorder %s1144_s28, 1 }
   0x9   : > { %p197_p3 = scmp.ne.s32.totalorder %s1067_s25, %s1063_s24  ;;  %p198_p4 = scmp.eq.s32.totalorder %s725_s29, 1 }
   0xa   : > { %s1159_s10 = scalar_select %p179_p1, %s1071_s26, %s181_s8  }
   0xb   : > { %p1161_p5 = por %p192_p2, %p191_p0  ;;  %p1165_p6 = por %p198_p4, %p197_p3 }
   0xc   : > { %p726_p7 = scmp.ge.s32.totalorder %s1075_s27, 1  ;;  %p205_p8 = scmp.lt.s32.totalorder %s1075_s27, 3 }
   0xd   : > { %p900_p9 = scmp.eq.s32.totalorder %s1144_s28, 0  ;;  %s222_s16 = sshll.u32 %s1256_s3, 4  ;;  %s223_s16 = int_to_ptr.hbm [resolvable:$true] %s222_s16 }
   0xe   : > { %p1172_p10 = pnand %p726_p7, %p205_p8  ;;  %s1077_s17 = smov [#allocation2]  }
   0xf   : > { %s224_s18 = sshll.u32 %s1077_s17, 4  ;;  %s239_s21 = sshll.u32 %s1258_s5, 4  ;;  %s225_s18 = int_to_ptr.vmem [resolvable:$true] %s224_s18  ;;  %s240_s21 = int_to_ptr.hbm [resolvable:$true] %s239_s21 }
  0x10   : > { %p889_p11 = pneg %p1172_p10  ;;  %s1078_s22 = smov 64  }
  0x11   : > { %s1079_s23 = smov 4   ;;  %s1080_s29 = smov [#allocation5]  }
  0x12   : > { %p890_p12 = pnand %p900_p9, %p889_p11  ;;  %s241_s8 = sshll.u32 %s1080_s29, 4  ;;  %s242_s8 = int_to_ptr.vmem [resolvable:$true] %s241_s8 }
  0x13   : > { %269 = sbr.rel (%p1172_p10) target bundleno = 476 (0x1dc), region = 48 }
  0x14   : > { %892 = dma.hbm_to_vmem [thread:$0]  (!%p890_p12), %s223_s16, 2048, %s225_s18, [#allocation3], %s1078_s22, %s1078_s22, %s1079_s23  }
  0x15   : > { %895 = dma.hbm_to_vmem [thread:$0]  (!%p890_p12), %s240_s21, 1024, %s242_s8, [#allocation6], %s1078_s22, %s1078_s22, %s1079_s23  }
  0x18   : > { %1050 = dma.done.wait (%p900_p9), [#allocation3], 2048  }
  0x19   : > { %1052 = vsyncadd (%p900_p9), [#allocation3], 4294965248 }
  0x1a   : > { %1054 = dma.done.wait (%p900_p9), [#allocation6], 1024  }
  0x1b   : > { %1056 = vsyncadd (%p900_p9), [#allocation6], 4294966272  ;;  %s734_s9 = sshll.u32 %s1144_s28, 1  ;;  %v742_v0 = vld [vmem:[%s1254_s1] sm:$0xf]  ;;  %v861_v5 = vld [vmem:[#allocation2 + $0x38] sm:$0xff] }
  0x1c   : > { %p308_p13 = scmp.lt.s32.totalorder %s734_s9, 3  ;;  %v853_v1 = vld [vmem:[%s1254_s1 + $0x4] sm:$0xf0]  ;;  %v852_v3 = vld [vmem:[%s1254_s1 + $0x4] sm:$0xf]  ;;  %vm340_vm0 = vcmask 130048   ;;  %510 = vmatpush.bf16.msra.mxu2 %v861_v5 }
  0x1d   : > { %v743_v2 = vor.u32 %v853_v1, %v742_v0  ;;  %v744_v4 = vld [vmem:[%s1254_s1 + $0x8] sm:$0xf0]  ;;  %v860_v8 = vld [vmem:[#allocation2 + $0x30] sm:$0xff]  ;;  %v858_v10 = vld [vmem:[#allocation2 + $0x20] sm:$0xff]  ;;  %s304_s13 = sand.u32 1, %s1067_s25   ;;  %s878_s19 = sshll.u32 %s1144_s28, 4 }
  0x1e   : > { %s1269_s9 = smov (!%p308_p13, %s734_s9), 3  ;;  %v747_v7 = vor.u32 %v852_v3, %v744_v4  ;;  %v859_v9 = vld [vmem:[#allocation2 + $0x28] sm:$0xff]  ;;  %v857_v11 = vld [vmem:[#allocation2 + $0x18] sm:$0xff]  ;;  %v856_v13 = vld [vmem:[#allocation2 + $0x10] sm:$0xff]  ;;  %s637_s22 = scalar_lea.hbm %s1260_s7, %s878_s19 }
  0x1f   : > { %s735_s14 = sshll.u32 %s1269_s9, 2  ;;  %351 = vmatpush.bf16.msra.mxu1 %v743_v2  ;;  %v869_v12 = vld [vmem:[#allocation2 + $0x78] sm:$0xff]  ;;  %v868_v14 = vld [vmem:[#allocation2 + $0x70] sm:$0xff]  ;;  %v855_v15 = vld [vmem:[#allocation2 + $0x8] sm:$0xff]  ;;  %s640_s8 = sshll.u32 %s637_s22, 4  ;;  %s641_s8 = int_to_ptr.hbm [resolvable:$true] %s640_s8 }
  0x20   : > { %s311_s16 = scalar_lea.vmem %s1253_s0, %s735_s14  ;;  %511 = vmatpush.bf16.msra.mxu2 %v860_v8  ;;  %524 = vmatpush.bf16.msra.mxu3 %v869_v12  ;;  %v867_v16 = vld [vmem:[#allocation2 + $0x68] sm:$0xff]  ;;  %v854_v17 = vld [vmem:[#allocation2] sm:$0xff]  ;;  %v865_v19 = vld [vmem:[#allocation2 + $0x58] sm:$0xff]  ;;  %s626_s9 = scalar_lea.sflag [#allocation4], %s304_s13 }
  0x21   : > { %v851_v6 = vld [vmem:[%s311_s16] sm:$0xff]  ;;  %v864_v20 = vld [vmem:[#allocation2 + $0x50] sm:$0xff]  ;;  %v863_v21 = vld [vmem:[#allocation2 + $0x48] sm:$0xff]  ;;  %s733_s16 = sshll.u32 %s304_s13, 4  ;;  %s1019_s14 = sshra.s32 %s641_s8, 4  ;;  %s1020_s14 = int_to_ptr.hbm [resolvable:$true] %s1019_s14 }
  0x22   : > { %748 = vmatmul.msk.bf16.vlgmr.msra.gmra.mxu1 %vm340_vm0, %v851_v6  ;;  %v866_v18 = vld [vmem:[#allocation2 + $0x60] sm:$0xff]  ;;  %v877_v40 = vld [vmem:[#allocation5 + $0x38] sm:$0xff]  ;;  %v876_v41 = vld [vmem:[#allocation5 + $0x30] sm:$0xff]  ;;  %s306_s23 = scalar_lea.vmem [#allocation7], %s733_s16  ;;  %s1021_s28 = scalar_lea.hbm %s1020_s14, 16 }
  0x23   : > { %365 = vmatpush.bf16.msrb.mxu1 %v747_v7  ;;  %v862_v22 = vld [vmem:[#allocation2 + $0x40] sm:$0xff]  ;;  %609 = vmatpush.bf16.msra.mxu0 %v877_v40  ;;  %v875_v42 = vld [vmem:[#allocation5 + $0x28] sm:$0xff]  ;;  %v873_v44 = vld [vmem:[#allocation5 + $0x18] sm:$0xff]  ;;  %s638_s29 = sshll.u32 %s306_s23, 4  ;;  %p1022_p0 = scmp.ne.s32.totalorder %s1020_s14, %s1021_s28  ;;  %s639_s29 = int_to_ptr.vmem [resolvable:$true] %s638_s29 }
  0x24   : > { %512 = vmatpush.bf16.msra.mxu2 %v859_v9  ;;  %525 = vmatpush.bf16.msra.mxu3 %v868_v14  ;;  %v319_v23 = vld [vmem:[%s1255_s2] sm:$0x3]  ;;  %v872_v45 = vld [vmem:[#allocation5 + $0x10] sm:$0xff]  ;;  %v871_v46 = vld [vmem:[#allocation5 + $0x8] sm:$0xff]  ;;  %s1025_s16 = scalar_lea.hbm %s1260_s7, 32  ;;  %p1026_p3 = scmp.lt.s32.totalorder %s1020_s14, %s1260_s7 }
  0x25   : > { %v321_v25 = vperm.slane %v319_v23, 0  ;;  %v322_v33 = vperm.slane %v319_v23, 1  ;;  %v874_v43 = vld [vmem:[#allocation5 + $0x20] sm:$0xff]  ;;  %p1023_p1 = pnand %p1022_p0, %p1161_p5  ;;  %p1027_p4 = scmp.lt.s32.totalorder %s1025_s16, %s1021_s28 }
  0x26   : > { %v870_v47 = vld [vmem:[#allocation5] sm:$0xff] }
  0x27   : > { %610 = vmatpush.bf16.msra.mxu0 %v876_v41  ;;  %v943_v50 = vld [vmem:[%s1257_s4] ss:$0 sm:$0xff]  ;;  %p1024_p2 = pneg %p1023_p1  ;;  %p1028_p7 = por %p1027_p4, %p1026_p3 }
  0x28   : > { %513 = vmatpush.bf16.msra.mxu2 %v858_v10  ;;  %526 = vmatpush.bf16.msra.mxu3 %v867_v16  ;;  %v944_v60 = vld [vmem:[%s1259_s6] ss:$0 sm:$0xff] }
  0x29   : > { %p1029_p8 = pnand %p1028_p7, %p1024_p2 }
  0x2b   : > { %611 = vmatpush.bf16.msra.mxu0 %v875_v42 }
  0x2c   : > { %514 = vmatpush.bf16.msra.mxu2 %v857_v11  ;;  %527 = vmatpush.bf16.msra.mxu3 %v866_v18 }
  0x2f   : > { %612 = vmatpush.bf16.msra.mxu0 %v874_v43 }
  0x30   : > { %515 = vmatpush.bf16.msra.mxu2 %v856_v13  ;;  %528 = vmatpush.bf16.msra.mxu3 %v865_v19 }
  0x32   : > { %749 = vmatmul.msk.bf16.vlgmr.msrb.gmra.mxu1 %vm340_vm0, %v851_v6 }
  0x33   : > { %613 = vmatpush.bf16.msra.mxu0 %v873_v44 }
  0x34   : > { %516 = vmatpush.bf16.msra.mxu2 %v855_v15  ;;  %529 = vmatpush.bf16.msra.mxu3 %v864_v20 }
  0x37   : > { %614 = vmatpush.bf16.msra.mxu0 %v872_v45 }
  0x38   : > { %517 = vmatpush.bf16.msra.mxu2 %v854_v17  ;;  %530 = vmatpush.bf16.msra.mxu3 %v863_v21 }
  0x3b   : > { %615 = vmatpush.bf16.msra.mxu0 %v871_v46 }
  0x3c   : > { %531 = vmatpush.bf16.msra.mxu3 %v862_v22 }
  0x3f   : > { %616 = vmatpush.bf16.msra.mxu0 %v870_v47 }
  0x9f   : > { %v353_v24 = vpop.f32.mrf.mxu1 }
  0xa0   : > { %v354_v26 = vadd.f32 %v353_v24, %v321_v25 }
  0xa2   : > { %v372_v29 = vmax.f32 %v354_v26, 0.0 }
  0xa7   : > { %v355_v27 = vpop.f32.mrf.mxu1 }
  0xa8   : > { %v356_v28 = vadd.f32 %v355_v27, %v321_v25 }
  0xaa   : > { %v374_v30 = vmax.f32 %v356_v28, 0.0 }
  0xac   : > { %v376_v31 = vpack.c.bf16 %v374_v30, %v372_v29 }
  0xae   : > { %518 = vmatmul.bf16.vlgmr.msra.gmra.mxu2 %v376_v31 }
  0xaf   : > { %v367_v32 = vpop.f32.mrf.mxu1 }
  0xb0   : > { %v368_v34 = vadd.f32 %v367_v32, %v322_v33 }
  0xb2   : > { %v373_v37 = vmax.f32 %v368_v34, 0.0 }
  0xb7   : > { %v369_v35 = vpop.f32.mrf.mxu1 }
  0xb8   : > { %v370_v36 = vadd.f32 %v369_v35, %v322_v33 }
  0xba   : > { %v375_v38 = vmax.f32 %v370_v36, 0.0 }
  0xbc   : > { %v377_v39 = vpack.c.bf16 %v375_v38, %v373_v37 }
  0xbe   : > { %532 = vmatmul.bf16.vlgmr.msra.gmra.mxu3 %v377_v39 }
 0x131   : > { %v519_v48 = vpop.f32.mrf.mxu2 }
 0x132   : > { %v520_v52 = vadd.f32 %v943_v50, %v519_v48 }
 0x139   : > { %v521_v51 = vpop.f32.mrf.mxu2 }
 0x13a   : > { %v522_v53 = vadd.f32 %v943_v50, %v521_v51 }
 0x141   : > { %v533_v49 = vpop.f32.mrf.mxu3 }
 0x142   : > { %v534_v54 = vadd.f32 %v533_v49, %v520_v52 }
 0x144   : > { %v538_v57 = vmax.f32 %v534_v54, 0.0 }
 0x149   : > { %v535_v55 = vpop.f32.mrf.mxu3 }
 0x14a   : > { %v536_v56 = vadd.f32 %v535_v55, %v522_v53 }
 0x14c   : > { %v539_v58 = vmax.f32 %v536_v56, 0.0 }
 0x14e   : > { %v540_v59 = vpack.c.bf16 %v539_v58, %v538_v57 }
 0x150   : > { %617 = vmatmul.bf16.vlgmr.msra.gmra.mxu0 %v540_v59 }
 0x1cd   : > { %v618_v61 = vpop.f32.mrf.mxu0 }
 0x1ce   : > { %v619_v62 = vadd.f32 %v944_v60, %v618_v61 }
 0x1d0   : > { %623 = vst [vmem:[%s306_s23] sm:$0xff] %v619_v62 }
 0x1d5   : > { %v620_v63 = vpop.f32.mrf.mxu0 }
 0x1d6   : > { %v621_v0 = vadd.f32 %v944_v60, %v620_v63 }
 0x1d8   : > { %624 = vst [vmem:[%s306_s23 + $0x8] sm:$0xff] %v621_v0 }
 0x1d9   : > { %1032 = shalt.err (!%p1029_p8)
}
 0x1da   : > { %s1081_s13 = smov 128   ;;  %s1082_s20 = smov 8  }
 0x1db   : > { %887 = dma.vmem_to_hbm [thread:$0]  (%p1161_p5), %s639_s29, 256, %s641_s8, %s626_s9, %s1081_s13, %s1081_s13, %s1082_s20  }
 0x1dc PF: > { %p904_p9 = scmp.ge.s32.totalorder %s1075_s27, 2  ;;  %s655_s21 = sand.u32 1, %s1063_s24  }
 0x1dd   : > { %s656_s22 = scalar_lea.sflag [#allocation4], %s655_s21 }
 0x1de   : > { %p897_p10 = pnand %p904_p9, %p1165_p6 }
 0x1e0   : > { %p898_p11 = pneg %p897_p10 }
 0x1e2   : > { %1058 = dma.done.wait (%p898_p11), %s656_s22, 256  }
 0x1e3   : > { %1060 = vsyncadd (%p898_p11), %s656_s22, 4294967040  ;;  %p19_p12 = scmp.ge.s32.totalorder %s1148_s30, 4   ;;  %s1264_s24 = smov %s1067_s25 }
 0x1e4   : > { %s1265_s25 = smov %s1071_s26  ;;  %s1266_s26 = smov %s1159_s10 }
 0x1e5   : > { %s1267_s27 = smov %s1148_s30  ;;  %21 = sbr.rel (!%p19_p12) target bundleno = 5 (0x5), region = 92 }
 0x1ea   :  { %662 = vsyncpa [#allocation3], 1 }
 0x1eb   :  { %664 = vsyncpa [#allocation3 + $0x1], 1 }
 0x1ec   :  { %665 = vsyncpa [#allocation6], 1 }
 0x1ed   :  { %666 = vsyncpa [#allocation4], 1 }
 0x1ee   :  { %668 = vsyncpa [#allocation4 + $0x1], 1 }

</bundles_post_ra>
